<compile_context>
chip_gen: v7x
topology: tpu7x:2x2x1
jax: 0.10.0
libtpu: 0.0.40
codegen_flags: <defaults>
</compile_context>

<pallas_src>
import functools

import jax
import jax.numpy as jnp
from jax.experimental import pallas as pl
from jax.experimental.pallas import tpu as pltpu


def _simmin_kernel(x_ref, w_ref, part_ref, *, one_plus_margin, total,
                   blocks_per_chunk, mask_tail):
    # grid = (C, K): axis 0 = parallel chunks (megacore on v7x),
    #                axis 1 = reduction over row-blocks (last, "arbitrary").
    k = pl.program_id(1)

    @pl.when(k == 0)
    def _():
        # Output block index is constant in k -> it stays VMEM-resident and
        # acts as the accumulator; zero it on the first reduction step.
        part_ref[...] = jnp.zeros_like(part_ref)

    x = x_ref[...].astype(jnp.float32)
    w = w_ref[...].astype(jnp.float32)
    x = jnp.clip(x, 0.0001, 0.9999)
    # Constant folded: log((1 + margin) - x).
    val = jnp.log(one_plus_margin - x) * w

    tm, lanes = x_ref.shape
    if mask_tail:
        # Select away anything beyond the true element count: host padding,
        # the undefined region of a partial edge block, and duplicated /
        # empty block slots (C > 1).  jnp.where is a select, so NaN/garbage
        # in the invalid region cannot leak into the sum.
        c = pl.program_id(0)
        row0 = (c * blocks_per_chunk + k) * tm
        rows = row0 + jax.lax.broadcasted_iota(jnp.int32, (tm, lanes), 0)
        cols = jax.lax.broadcasted_iota(jnp.int32, (tm, lanes), 1)
        flat = rows * lanes + cols          # NOTE: int32 -> fine for < 2^31 elems
        val = jnp.where(flat < total, val, 0.0)

    # Reduce only along the vreg-group (sublane-block) axis: cheap VPU adds
    # that hide under the DMA; the single cross-lane reduce happens in JAX on
    # the tiny (C, 8, 128) partials output.
    part_ref[...] += val.reshape(tm // 8, 8, lanes).sum(axis=0, keepdims=True)


def _row_align(dtype):
    # Sublane packing: f32 -> 8 rows per vreg group, bf16 -> 16, int8/fp8 -> 32.
    return 8 * max(1, 4 // jnp.dtype(dtype).itemsize)


def sim_min_loss(x, weights, margin=0.0, *, tile_m=4096, lanes=128,
                 num_chunks=1):
    """Pallas implementation of SimMinLoss.forward(x, weights).

    num_chunks: leading 'parallel' grid axis.  Leave at 1 on single-TensorCore
    chips (v5e/v6e); use 2 on v7x so both TensorCores stream from HBM.
    """
    assert x.shape == weights.shape, "x and weights must have the same shape"
    total = int(x.size)
    one_plus_margin = 1.0 + float(margin)
    # NOTE: like the reference, only x is clamped; margin <= -0.9999 makes the
    # log argument non-positive for every element — same behavior as PyTorch.

    xf = x.reshape(-1)
    wf = weights.reshape(-1)

    # Minimal host-side padding: only up to a multiple of row_align*lanes so
    # the flat data can be viewed as an (M, 128) slab with M a multiple of the
    # sublane packing.  For the common case (total already divisible) this is
    # free — no HBM copy at all.
    row_align = max(_row_align(x.dtype), _row_align(weights.dtype))
    group = row_align * lanes
    padded_total = -(-total // group) * group
    pad = padded_total - total
    if pad:
        # Pad values never reach the sum (in-kernel mask selects them away),
        # but pad x with 0.0 anyway so the log argument stays benign.
        xf = jnp.concatenate([xf, jnp.zeros((pad,), xf.dtype)])
        wf = jnp.concatenate([wf, jnp.zeros((pad,), wf.dtype)])

    m_rows = padded_total // lanes          # multiple of row_align (>= 8)
    x2 = xf.reshape(m_rows, lanes)
    w2 = wf.reshape(m_rows, lanes)

    C = max(1, int(num_chunks))
    tm = min(int(tile_m), m_rows)
    tm = max(row_align, (tm // row_align) * row_align)
    num_blocks = -(-m_rows // tm)           # ceil
    K = -(-num_blocks // C)                 # reduction steps per chunk
    # Any covered element beyond the true data (host pad, partial edge block,
    # duplicated slots) -> enable the in-kernel mask (static flag).
    mask_tail = (C * K * tm * lanes) > total

    kernel = functools.partial(
        _simmin_kernel,
        one_plus_margin=one_plus_margin,
        total=total,
        blocks_per_chunk=K,
        mask_tail=mask_tail,
    )

    def in_map(c, k, _K=K, _nb=num_blocks):
        # Clamp so no block slot is ever out of bounds; duplicated slots are
        # fully masked inside the kernel (their logical row0 >= valid rows).
        return (jnp.minimum(c * _K + k, _nb - 1), 0)

    out_bytes = C * 8 * lanes * 4
    cost = pl.CostEstimate(
        flops=5 * total,
        transcendentals=total,
        bytes_accessed=int(x2.nbytes) + int(w2.nbytes) + out_bytes,
    )

    partials = pl.pallas_call(
        kernel,
        out_shape=jax.ShapeDtypeStruct((C, 8, lanes), jnp.float32),
        grid_spec=pltpu.PrefetchScalarGridSpec(
            num_scalar_prefetch=0,
            grid=(C, K),
            in_specs=[
                pl.BlockSpec((tm, lanes), in_map),
                pl.BlockSpec((tm, lanes), in_map),
            ],
            out_specs=pl.BlockSpec((1, 8, lanes), lambda c, k: (c, 0, 0)),
        ),
        compiler_params=pltpu.CompilerParams(
            dimension_semantics=("parallel", "arbitrary"),
            vmem_limit_bytes=32 * 1024 * 1024,
        ),
        cost_estimate=cost,
    )(x2, w2)

    # Single tiny cross-lane/sublane reduce on the (C, 8, 128) partials.
    return -(jnp.sum(partials) / jnp.float32(total))


def sim_min_loss_ref(x, weights, margin=0.0):
    x = jnp.clip(x.astype(jnp.float32), 0.0001, 0.9999)
    return -jnp.mean(jnp.log(1.0 - x + margin) * weights.astype(jnp.float32))


if __name__ == "__main__":
    key = jax.random.PRNGKey(0)
    kx, kw, kx2, kw2, kx3, kw3 = jax.random.split(key, 6)

    # 1) Small NCHW-like similarity map: single full-array block, no padding,
    #    no masking (total = 2048 is a multiple of 8*128).
    x = jax.random.uniform(kx, (2, 4, 16, 16), dtype=jnp.float32)
    weights = jax.random.uniform(kw, (2, 4, 16, 16), dtype=jnp.float32)
    loss = sim_min_loss(x, weights, margin=0.0)
    jax.block_until_ready(loss)
    ref = sim_min_loss_ref(x, weights, margin=0.0)
    assert jnp.allclose(loss, ref, rtol=1e-5, atol=1e-6), (loss, ref)

    # 2) Ragged element count (3*5*7*11 = 1155): exercises the minimal pad +
    #    in-kernel flat-index masking, still single block.
    xr = jax.random.uniform(kx2, (3, 5, 7, 11), dtype=jnp.float32)
    wr = jax.random.uniform(kw2, (3, 5, 7, 11), dtype=jnp.float32)
    loss_r = sim_min_loss(xr, wr, margin=0.1)
    jax.block_until_ready(loss_r)
    ref_r = sim_min_loss_ref(xr, wr, margin=0.1)
    assert jnp.allclose(loss_r, ref_r, rtol=1e-5, atol=1e-6), (loss_r, ref_r)

    # 3) Tiled + masked path with a partial edge block and a 2-chunk parallel
    #    axis (v7x-style), forced small with tile_m=64: 76800 elems = 600 rows,
    #    10 blocks of 64 rows (last one 24 valid rows), no host padding.
    xb = jax.random.uniform(kx3, (4, 12, 40, 40), dtype=jnp.float32)
    wb = jax.random.uniform(kw3, (4, 12, 40, 40), dtype=jnp.float32)
    loss_b = sim_min_loss(xb, wb, margin=0.0, tile_m=64, num_chunks=2)
    jax.block_until_ready(loss_b)
    ref_b = sim_min_loss_ref(xb, wb, margin=0.0)
    assert jnp.allclose(loss_b, ref_b, rtol=1e-5, atol=1e-6), (loss_b, ref_b)

    # 4) bf16 pass-through (kernel upcasts in VMEM; halves HBM traffic when the
    #    producer already emits bf16).
    xh = x.astype(jnp.bfloat16)
    wh = weights.astype(jnp.bfloat16)
    loss_h = sim_min_loss(xh, wh, margin=0.0)
    jax.block_until_ready(loss_h)
    ref_h = sim_min_loss_ref(xh, wh, margin=0.0)
    assert jnp.allclose(loss_h, ref_h, rtol=1e-4, atol=1e-5), (loss_h, ref_h)

    print("KERNEL_OK")
</pallas_src>

<mosaic_0001>
module attributes {stable_mosaic.version = 11 : i64} {
  func.func @_simmin_kernel(%arg0: i32, %arg1: i32, %arg2: memref<16x128xf32, #tpu.memory_space<vmem>>, %arg3: memref<16x128xf32, #tpu.memory_space<vmem>>, %arg4: memref<1x8x128xf32, #tpu.memory_space<vmem>>) attributes {dimension_semantics = [#tpu.dimension_semantics<parallel>, #tpu.dimension_semantics<arbitrary>], iteration_bounds = array<i64: 1, 1>, scalar_prefetch = 0 : i64, scratch_operands = 0 : i64, tpu.core_type = #tpu.core_type<tc>, window_params = [{transform_indices = @transform_0, window_bounds = array<i64: 16, 128>}, {transform_indices = @transform_1, window_bounds = array<i64: 16, 128>}, {transform_indices = @transform_2, window_bounds = array<i64: 1, 8, 128>}]} {
    %c0_i32 = arith.constant 0 : i32
    %0 = arith.cmpi eq, %arg1, %c0_i32 : i32
    %1 = arith.extui %0 : i1 to i32
    %c0_i32_0 = arith.constant 0 : i32
    %2 = arith.cmpi ne, %1, %c0_i32_0 : i32
    scf.if %2 {
      %cst_13 = arith.constant 0.000000e+00 : f32
      %19 = vector.broadcast %cst_13 : f32 to vector<1x8x128xf32>
      %c0_14 = arith.constant 0 : index
      %c0_15 = arith.constant 0 : index
      %c0_16 = arith.constant 0 : index
      %20 = vector.load %arg4[%c0_14, %c0_15, %c0_16] : memref<1x8x128xf32, #tpu.memory_space<vmem>>, vector<1x8x128xf32>
      tpu.vector_store %arg4[%c0_14, %c0_15, %c0_16], %19 {strides = array<i32>} : memref<1x8x128xf32, #tpu.memory_space<vmem>>, vector<1x8x128xf32>,
    } else {
    }
    %c0 = arith.constant 0 : index
    %c0_1 = arith.constant 0 : index
    %3 = vector.load %arg2[%c0, %c0_1] : memref<16x128xf32, #tpu.memory_space<vmem>>, vector<16x128xf32>
    %c0_2 = arith.constant 0 : index
    %c0_3 = arith.constant 0 : index
    %4 = vector.load %arg3[%c0_2, %c0_3] : memref<16x128xf32, #tpu.memory_space<vmem>>, vector<16x128xf32>
    %cst = arith.constant 9.99999974E-5 : f32
    %cst_4 = arith.constant 0.999899983 : f32
    %5 = vector.broadcast %cst : f32 to vector<16x128xf32>
    %6 = arith.maximumf %5, %3 : vector<16x128xf32>
    %7 = vector.broadcast %cst_4 : f32 to vector<16x128xf32>
    %8 = arith.minimumf %7, %6 : vector<16x128xf32>
    %cst_5 = arith.constant 1.000000e+00 : f32
    %9 = vector.broadcast %cst_5 : f32 to vector<16x128xf32>
    %10 = arith.subf %9, %8 : vector<16x128xf32>
    %11 = math.log %10 : vector<16x128xf32>
    %12 = arith.mulf %11, %4 : vector<16x128xf32>
    %c0_6 = arith.constant 0 : index
    %c0_7 = arith.constant 0 : index
    %c0_8 = arith.constant 0 : index
    %13 = vector.load %arg4[%c0_6, %c0_7, %c0_8] : memref<1x8x128xf32, #tpu.memory_space<vmem>>, vector<1x8x128xf32>
    %14 = vector.shape_cast %12 : vector<16x128xf32> to vector<2x8x128xf32>
    %cst_9 = arith.constant dense<0.000000e+00> : vector<8x128xf32>
    %15 = vector.multi_reduction <add>, %14, %cst_9 [0] : vector<2x8x128xf32> to vector<8x128xf32>
    %16 = vector.shape_cast %15 : vector<8x128xf32> to vector<1x8x128xf32>
    %17 = arith.addf %13, %16 : vector<1x8x128xf32>
    %c0_10 = arith.constant 0 : index
    %c0_11 = arith.constant 0 : index
    %c0_12 = arith.constant 0 : index
    %18 = vector.load %arg4[%c0_10, %c0_11, %c0_12] : memref<1x8x128xf32, #tpu.memory_space<vmem>>, vector<1x8x128xf32>
    tpu.vector_store %arg4[%c0_10, %c0_11, %c0_12], %17 {strides = array<i32>} : memref<1x8x128xf32, #tpu.memory_space<vmem>>, vector<1x8x128xf32>,
    return
  }
  func.func @transform_0(%arg0: i32, %arg1: i32) -> (i32, i32) {
    %c1_i32 = arith.constant 1 : i32
    %0 = arith.muli %arg0, %c1_i32 : i32
    %1 = arith.addi %0, %arg1 : i32
    %c0_i32 = arith.constant 0 : i32
    %2 = arith.minsi %1, %c0_i32 : i32
    %c0_i32_0 = arith.constant 0 : i32
    %c0_i32_1 = arith.constant 0 : i32
    return %2, %c0_i32_0 : i32, i32
  }
  func.func @transform_1(%arg0: i32, %arg1: i32) -> (i32, i32) {
    %c1_i32 = arith.constant 1 : i32
    %0 = arith.muli %arg0, %c1_i32 : i32
    %1 = arith.addi %0, %arg1 : i32
    %c0_i32 = arith.constant 0 : i32
    %2 = arith.minsi %1, %c0_i32 : i32
    %c0_i32_0 = arith.constant 0 : i32
    %c0_i32_1 = arith.constant 0 : i32
    return %2, %c0_i32_0 : i32, i32
  }
  func.func @transform_2(%arg0: i32, %arg1: i32) -> (i32, i32, i32) {
    %c0_i32 = arith.constant 0 : i32
    %c0_i32_0 = arith.constant 0 : i32
    %c0_i32_1 = arith.constant 0 : i32
    return %arg0, %c0_i32, %c0_i32_0 : i32, i32, i32
  }
}

</mosaic_0001>

<bundles_post_ra>
// kernel: tpu_custom_call.1
= control target key start
LH: loop header
LB: loop body
LE: loop exit
PB: predicated region body
PF: predicated region fallthrough
CT: control target
= control target key end

     0   :  { %7 = vsyncpa [#allocation3], 0  ;;  %s243_s0 = inlined_call_operand.hbm [shape: f32[16,128], index: 0, kind: input, shape index: {}]   ;;  %s244_s1 = inlined_call_operand.hbm [shape: f32[16,128], index: 1, kind: input, shape index: {}]   ;;  %s245_s2 = inlined_call_operand.hbm [shape: f32[1,8,128], index: 2, kind: output, shape index: {}]  }
   0x1   :  { %8 = vsyncpa [#allocation6], 0 }
   0x2   :  { %9 = vsyncpa [#allocation4], 0  ;;  %s187_s9 = smov [#allocation2]   ;;  %s115_s13 = scalar_lea.hbm %s243_s0, 256 }
   0x3   :  { %s21_s10 = sshll.u32 %s187_s9, 4  ;;  %p116_p0 = scmp.ne.s32.totalorder %s243_s0, %s115_s13  ;;  %s22_s10 = int_to_ptr.vmem [resolvable:$true] %s21_s10 }
   0x4   :  { %p119_p1 = scmp.lt.u32.totalorder %s115_s13, %s243_s0 }
   0x6   :  { %p121_p2 = pnand %p119_p1, %p116_p0 }
   0x8   :  { %124 = shalt.err (!%p121_p2)
}
   0x9   :  { %s125_s18 = scalar_lea.vmem %s22_s10, 256  ;;  %p130_p4 = scmp.lt.s32.totalorder %s22_s10, %s22_s10 }
   0xa   :  { %p126_p3 = scmp.ne.s32.totalorder %s22_s10, %s125_s18  ;;  %p131_p5 = scmp.lt.s32.totalorder %s125_s18, %s125_s18 }
   0xc   :  { %p132_p6 = por %p131_p5, %p130_p4 }
   0xe   :  { %p133_p7 = pnand %p132_p6, %p126_p3 }
  0x10   :  { %136 = shalt.err (!%p133_p7)
}
  0x11   :  { %s188_s19 = smov 128   ;;  %s189_s20 = smov 8  }
  0x12   :  { %27 = dma.hbm_to_vmem [thread:$0]  %s243_s0, 256, %s22_s10, [#allocation3], %s188_s19, %s188_s19, %s189_s20  }
  0x13   :  { %s190_s23 = smov [#allocation5]   ;;  %s137_s27 = scalar_lea.hbm %s244_s1, 256 }
  0x14   :  { %s39_s24 = sshll.u32 %s190_s23, 4  ;;  %p138_p8 = scmp.ne.s32.totalorder %s244_s1, %s137_s27  ;;  %s40_s24 = int_to_ptr.vmem [resolvable:$true] %s39_s24 }
  0x15   :  { %p141_p9 = scmp.lt.u32.totalorder %s137_s27, %s244_s1 }
  0x17   :  { %p143_p10 = pnand %p141_p9, %p138_p8 }
  0x19   :  { %146 = shalt.err (!%p143_p10)
}
  0x1a   :  { %s147_s4 = scalar_lea.vmem %s40_s24, 256  ;;  %p152_p12 = scmp.lt.s32.totalorder %s40_s24, %s40_s24 }
  0x1b   :  { %p148_p11 = scmp.ne.s32.totalorder %s40_s24, %s147_s4  ;;  %p153_p13 = scmp.lt.s32.totalorder %s147_s4, %s147_s4 }
  0x1d   :  { %p154_p0 = por %p153_p13, %p152_p12 }
  0x1f   :  { %p155_p1 = pnand %p154_p0, %p148_p11 }
  0x21   :  { %158 = shalt.err (!%p155_p1)
}
  0x22   :  { %45 = dma.hbm_to_vmem [thread:$0]  %s244_s1, 256, %s40_s24, [#allocation6], %s188_s19, %s188_s19, %s189_s20  }
  0x23   :  { %181 = dma.done.wait [#allocation3], 256  }
  0x24   :  { %182 = vsyncadd [#allocation3], 4294967040 }
  0x25   :  { %183 = dma.done.wait [#allocation6], 256  }
  0x26   :  { %184 = vsyncadd [#allocation6], 4294967040  ;;  %v65_v0 = vld [vmem:[#allocation2] sm:$0xff]  ;;  %v66_v1 = vld [vmem:[#allocation2 + $0x8] sm:$0xff]  ;;  %s191_s1 = smov [#allocation7]  }
  0x27   :  { %v69_v2 = vmax.f32 %v65_v0, 0.0001  ;;  %v70_v3 = vmax.f32 %v66_v1, 0.0001  ;;  %v67_v9 = vld [vmem:[#allocation5] sm:$0xff]  ;;  %v68_v11 = vld [vmem:[#allocation5 + $0x8] sm:$0xff] }
  0x28   :  { %s91_s6 = sshll.u32 %s191_s1, 4  ;;  %s92_s6 = int_to_ptr.vmem [resolvable:$true] %s91_s6 }
  0x29   :  { %v71_v4 = vmin.f32 %v69_v2, 0.9999  ;;  %v72_v5 = vmin.f32 %v70_v3, 0.9999  ;;  %s159_s7 = scalar_lea.vmem %s92_s6, 128  ;;  %p164_p3 = scmp.lt.s32.totalorder %s92_s6, %s92_s6 }
  0x2a   :  { %p160_p2 = scmp.ne.s32.totalorder %s92_s6, %s159_s7  ;;  %p165_p4 = scmp.lt.s32.totalorder %s159_s7, %s159_s7 }
  0x2b   :  { %v73_v6 = vsub.f32 1.0, %v71_v4  ;;  %v74_v7 = vsub.f32 1.0, %v72_v5 }
  0x2c   :  { %p166_p5 = por %p165_p4, %p164_p3 }
  0x2d   :  { %111 = vlog2.f32 %v73_v6 }
  0x2e   :  { %113 = vlog2.f32 %v74_v7  ;;  %p167_p6 = pnand %p166_p5, %p160_p2 }
  0x37   :  { %v112_v8 = vpop.eup %111 }
  0x38   :  { %v114_v10 = vpop.eup %113  ;;  %v76_v12 = vmul.f32 0.6931472, %v112_v8 }
  0x39   :  { %v78_v13 = vmul.f32 0.6931472, %v114_v10 }
  0x3a   :  { %v79_v14 = vmul.f32 %v76_v12, %v67_v9 }
  0x3b   :  { %v80_v15 = vmul.f32 %v78_v13, %v68_v11 }
  0x3d   :  { %v82_v16 = vadd.f32 %v80_v15, %v79_v14 }
  0x3f   :  { %84 = vst [vmem:[#allocation7] sm:$0xff] %v82_v16 }
  0x40   :  { %170 = shalt.err (!%p167_p6)
}
  0x41   :  { %s171_s10 = scalar_lea.hbm %s245_s2, 128 }
  0x42   :  { %p172_p7 = scmp.ne.s32.totalorder %s245_s2, %s171_s10  ;;  %p175_p8 = scmp.lt.u32.totalorder %s171_s10, %s245_s2 }
  0x44   :  { %p177_p9 = pnand %p175_p8, %p172_p7 }
  0x46   :  { %180 = shalt.err (!%p177_p9)
}
  0x47   :  { %94 = dma.vmem_to_hbm [thread:$0]  %s92_s6, 128, %s245_s2, [#allocation4]  }
  0x48   :  { %185 = dma.done.wait [#allocation4], 128  }
  0x49   :  { %186 = vsyncadd [#allocation4], 4294967168 }
  0x4a   :  { %98 = vsyncpa [#allocation3], 1 }
  0x4b   :  { %99 = vsyncpa [#allocation6], 1 }
  0x4c   :  { %100 = vsyncpa [#allocation4], 1 }

</bundles_post_ra>
